<compile_context>
chip_gen: v7x
topology: tpu7x:2x2x1
jax: 0.10.0
libtpu: 0.0.40
codegen_flags: <defaults>
</compile_context>

<pallas_src>
import jax
import jax.numpy as jnp
from jax import lax
from jax.experimental import pallas as pl
from jax.experimental.pallas import tpu as pltpu


def tiny_mlp_kernel(x_ref, w1_ref, b1_ref, w2_ref, b2_ref, o_ref):
    # x_ref : (TB, Np) bf16     w1_ref: (Np, Hp) bf16   b1_ref: (1, Hp) f32
    # w2_ref: (Hp, Np) bf16     b2_ref: (1, Np)  f32    o_ref : (TB, Np) out dtype
    x = x_ref[...]
    # First matmul on the MXU, f32 accumulation.
    h = jnp.dot(x, w1_ref[...], preferred_element_type=jnp.float32)   # (TB, Hp) f32
    # f32 epilogue: bias + ReLU.
    h = jnp.maximum(h + b1_ref[...], 0.0)
    # Second matmul: feed the MXU bf16 activations, accumulate in f32.
    h = h.astype(w2_ref.dtype)
    y = jnp.dot(h, w2_ref[...], preferred_element_type=jnp.float32)   # (TB, Np) f32
    y = y + b2_ref[...]
    o_ref[...] = jnp.tanh(y).astype(o_ref.dtype)


def tiny_mlp(x, w1, b1, w2, b2, *, tb=None, compute_dtype=jnp.bfloat16):
    """x: (B, N); w1: (N, H); b1: (H,); w2: (H, N); b2: (N,). Returns (B, N)."""
    B, N = x.shape
    H = w1.shape[1]
    out_dtype = x.dtype

    # ---- Lane-dense dims: zero-pad N and H up to multiples of 128 (exact). ----
    Np = max(128, pl.cdiv(N, 128) * 128)
    Hp = max(128, pl.cdiv(H, 128) * 128)
    if Np != N or Hp != H:
        x = jnp.pad(x, ((0, 0), (0, Np - N)))
        w1 = jnp.pad(w1, ((0, Np - N), (0, Hp - H)))
        b1 = jnp.pad(b1, (0, Hp - H))
        w2 = jnp.pad(w2, ((0, Hp - H), (0, Np - N)))
        b2 = jnp.pad(b2, (0, Np - N))

    # ---- Batch tile: fill the MXU M dim when possible; keep 8-sublane multiples. ----
    if tb is None:
        tb = 256 if B >= 256 else max(8, pl.cdiv(B, 8) * 8)
    Bp = pl.cdiv(B, tb) * tb
    if Bp != B:
        x = jnp.pad(x, ((0, Bp - B), (0, 0)))

    # ---- bf16 MXU operands, f32 biases for the f32 epilogue. ----
    xc = x.astype(compute_dtype)
    w1c = w1.astype(compute_dtype)
    w2c = w2.astype(compute_dtype)
    b1f = b1.reshape(1, Hp).astype(jnp.float32)
    b2f = b2.reshape(1, Np).astype(jnp.float32)

    grid = (Bp // tb,)

    # ---- Advisory cost estimate for the XLA scheduler. ----
    def _bytes(a):
        return a.size * a.dtype.itemsize

    cost = pl.CostEstimate(
        flops=4 * Bp * Np * Hp,                # two (Bp,Np,Hp)-sized matmuls
        transcendentals=Bp * Np,               # tanh
        bytes_accessed=_bytes(xc) + _bytes(w1c) + _bytes(w2c)
        + _bytes(b1f) + _bytes(b2f) + Bp * Np * jnp.dtype(out_dtype).itemsize,
    )

    # ---- VMEM budget: double-buffered x/o tiles + resident weights + biases. ----
    c_item = jnp.dtype(compute_dtype).itemsize
    o_item = jnp.dtype(out_dtype).itemsize
    vmem_bytes = (
        2 * tb * Np * c_item            # x tiles (double-buffered)
        + 2 * tb * Np * o_item          # out tiles (double-buffered)
        + (Np * Hp + Hp * Np) * c_item  # weights, VMEM-resident across the grid
        + (Hp + Np) * 4                 # biases (f32)
    )
    vmem_limit = min(64 * 1024 * 1024, max(2 * vmem_bytes + (4 << 20), 32 << 20))

    out = pl.pallas_call(
        tiny_mlp_kernel,
        out_shape=jax.ShapeDtypeStruct((Bp, Np), out_dtype),
        grid=grid,
        in_specs=[
            pl.BlockSpec((tb, Np), lambda i: (i, 0)),   # x: batch-tiled
            pl.BlockSpec((Np, Hp), lambda i: (0, 0)),   # W1: resident
            pl.BlockSpec((1, Hp), lambda i: (0, 0)),    # b1: resident
            pl.BlockSpec((Hp, Np), lambda i: (0, 0)),   # W2: resident
            pl.BlockSpec((1, Np), lambda i: (0, 0)),    # b2: resident
        ],
        out_specs=pl.BlockSpec((tb, Np), lambda i: (i, 0)),
        compiler_params=pltpu.CompilerParams(
            dimension_semantics=("parallel",),
            vmem_limit_bytes=int(vmem_limit),
        ),
        cost_estimate=cost,
    )(xc, w1c, b1f, w2c, b2f)

    return out[:B, :N]
    # TODO(synk): for N large enough that both bf16 weights exceed v7x's 64 MiB
    # VMEM, add an inner K/N reduction grid axis with a VMEM f32 accumulator.


def init_params(key, N, dtype=jnp.float32):
    """Deterministic PyTorch-style init: U(-1/sqrt(fan_in), 1/sqrt(fan_in))."""
    H = N // 4
    k1, k2, k3, k4 = jax.random.split(key, 4)
    bound1 = 1.0 / jnp.sqrt(jnp.array(N, dtype))   # fan_in of first Linear = N
    bound2 = 1.0 / jnp.sqrt(jnp.array(H, dtype))   # fan_in of second Linear = H
    # Stored already transposed to (in, out) for the kernel.
    w1 = jax.random.uniform(k1, (N, H), dtype, -bound1, bound1)
    b1 = jax.random.uniform(k2, (H,),   dtype, -bound1, bound1)
    w2 = jax.random.uniform(k3, (H, N), dtype, -bound2, bound2)
    b2 = jax.random.uniform(k4, (N,),   dtype, -bound2, bound2)
    return w1, b1, w2, b2


if __name__ == "__main__":
    key = jax.random.PRNGKey(0)
    kx, kp = jax.random.split(key)

    B, N = 8, 128           # N // 4 = 32 hidden units (padded to 128 in-wrapper)
    x = jax.random.normal(kx, (B, N), dtype=jnp.float32)
    w1, b1, w2, b2 = init_params(kp, N)

    out = tiny_mlp(x, w1, b1, w2, b2)
    out = jax.block_until_ready(out)

    # Pure-JAX f32 reference of the forward semantics (highest precision dots).
    h_ref = jnp.maximum(
        jnp.dot(x, w1, precision=lax.Precision.HIGHEST) + b1, 0.0)
    ref = jnp.tanh(
        jnp.dot(h_ref, w2, precision=lax.Precision.HIGHEST) + b2)

    assert out.shape == (B, N)
    # bf16 MXU operands with f32 accumulation: loose-but-meaningful tolerance
    # (outputs are bounded in [-1, 1] by tanh).
    assert jnp.allclose(out, ref, atol=2e-2, rtol=0.0), float(
        jnp.max(jnp.abs(out - ref)))

    print("KERNEL_OK")
</pallas_src>

<mosaic_0001>
module attributes {stable_mosaic.version = 11 : i64} {
  func.func @tiny_mlp_kernel(%arg0: i32, %arg1: memref<8x128xbf16, #tpu.memory_space<vmem>>, %arg2: memref<128x128xbf16, #tpu.memory_space<vmem>>, %arg3: memref<1x128xf32, #tpu.memory_space<vmem>>, %arg4: memref<128x128xbf16, #tpu.memory_space<vmem>>, %arg5: memref<1x128xf32, #tpu.memory_space<vmem>>, %arg6: memref<8x128xf32, #tpu.memory_space<vmem>>) attributes {dimension_semantics = [#tpu.dimension_semantics<parallel>], iteration_bounds = array<i64: 1>, scalar_prefetch = 0 : i64, scratch_operands = 0 : i64, tpu.core_type = #tpu.core_type<tc>, window_params = [{transform_indices = @transform_0, window_bounds = array<i64: 8, 128>}, {pipeline_mode = #tpu.pipeline_mode<synchronous>, transform_indices = @transform_1, window_bounds = array<i64: 128, 128>}, {pipeline_mode = #tpu.pipeline_mode<synchronous>, transform_indices = @transform_2, window_bounds = array<i64: 1, 128>}, {pipeline_mode = #tpu.pipeline_mode<synchronous>, transform_indices = @transform_3, window_bounds = array<i64: 128, 128>}, {pipeline_mode = #tpu.pipeline_mode<synchronous>, transform_indices = @transform_4, window_bounds = array<i64: 1, 128>}, {transform_indices = @transform_5, window_bounds = array<i64: 8, 128>}]} {
    %c0 = arith.constant 0 : index
    %c0_0 = arith.constant 0 : index
    %0 = vector.load %arg1[%c0, %c0_0] : memref<8x128xbf16, #tpu.memory_space<vmem>>, vector<8x128xbf16>
    %c0_1 = arith.constant 0 : index
    %c0_2 = arith.constant 0 : index
    %1 = vector.load %arg2[%c0_1, %c0_2] : memref<128x128xbf16, #tpu.memory_space<vmem>>, vector<128x128xbf16>
    %cst = arith.constant dense<0.000000e+00> : vector<8x128xf32>
    %2 = tpu.matmul %0, %1, %cst {dimension_numbers = #tpu.dot_dimension_numbers<[1], [0], [0], [1], [0, 0, 1, 1], [], []>} : vector<8x128xbf16>, vector<128x128xbf16>, vector<8x128xf32> -> vector<8x128xf32>
    %c0_3 = arith.constant 0 : index
    %c0_4 = arith.constant 0 : index
    %3 = vector.load %arg3[%c0_3, %c0_4] : memref<1x128xf32, #tpu.memory_space<vmem>>, vector<1x128xf32>
    %4 = vector.broadcast %3 : vector<1x128xf32> to vector<8x128xf32>
    %5 = arith.addf %2, %4 : vector<8x128xf32>
    %cst_5 = arith.constant 0.000000e+00 : f32
    %6 = vector.broadcast %cst_5 : f32 to vector<8x128xf32>
    %7 = arith.maximumf %5, %6 : vector<8x128xf32>
    %8 = arith.truncf %7 : vector<8x128xf32> to vector<8x128xbf16>
    %c0_6 = arith.constant 0 : index
    %c0_7 = arith.constant 0 : index
    %9 = vector.load %arg4[%c0_6, %c0_7] : memref<128x128xbf16, #tpu.memory_space<vmem>>, vector<128x128xbf16>
    %cst_8 = arith.constant dense<0.000000e+00> : vector<8x128xf32>
    %10 = tpu.matmul %8, %9, %cst_8 {dimension_numbers = #tpu.dot_dimension_numbers<[1], [0], [0], [1], [0, 0, 1, 1], [], []>} : vector<8x128xbf16>, vector<128x128xbf16>, vector<8x128xf32> -> vector<8x128xf32>
    %c0_9 = arith.constant 0 : index
    %c0_10 = arith.constant 0 : index
    %11 = vector.load %arg5[%c0_9, %c0_10] : memref<1x128xf32, #tpu.memory_space<vmem>>, vector<1x128xf32>
    %12 = vector.broadcast %11 : vector<1x128xf32> to vector<8x128xf32>
    %13 = arith.addf %10, %12 : vector<8x128xf32>
    %14 = math.tanh %13 : vector<8x128xf32>
    %c0_11 = arith.constant 0 : index
    %c0_12 = arith.constant 0 : index
    %15 = vector.load %arg6[%c0_11, %c0_12] : memref<8x128xf32, #tpu.memory_space<vmem>>, vector<8x128xf32>
    tpu.vector_store %arg6[%c0_11, %c0_12], %14 {strides = array<i32>} : memref<8x128xf32, #tpu.memory_space<vmem>>, vector<8x128xf32>,
    return
  }
  func.func @transform_0(%arg0: i32) -> (i32, i32) {
    %c0_i32 = arith.constant 0 : i32
    %c0_i32_0 = arith.constant 0 : i32
    return %arg0, %c0_i32 : i32, i32
  }
  func.func @transform_1(%arg0: i32) -> (i32, i32) {
    %c0_i32 = arith.constant 0 : i32
    %c0_i32_0 = arith.constant 0 : i32
    %c0_i32_1 = arith.constant 0 : i32
    return %c0_i32, %c0_i32_0 : i32, i32
  }
  func.func @transform_2(%arg0: i32) -> (i32, i32) {
    %c0_i32 = arith.constant 0 : i32
    %c0_i32_0 = arith.constant 0 : i32
    %c0_i32_1 = arith.constant 0 : i32
    return %c0_i32, %c0_i32_0 : i32, i32
  }
  func.func @transform_3(%arg0: i32) -> (i32, i32) {
    %c0_i32 = arith.constant 0 : i32
    %c0_i32_0 = arith.constant 0 : i32
    %c0_i32_1 = arith.constant 0 : i32
    return %c0_i32, %c0_i32_0 : i32, i32
  }
  func.func @transform_4(%arg0: i32) -> (i32, i32) {
    %c0_i32 = arith.constant 0 : i32
    %c0_i32_0 = arith.constant 0 : i32
    %c0_i32_1 = arith.constant 0 : i32
    return %c0_i32, %c0_i32_0 : i32, i32
  }
  func.func @transform_5(%arg0: i32) -> (i32, i32) {
    %c0_i32 = arith.constant 0 : i32
    %c0_i32_0 = arith.constant 0 : i32
    return %arg0, %c0_i32 : i32, i32
  }
}

</mosaic_0001>

<bundles_post_ra>
// kernel: tpu_custom_call.1
= control target key start
LH: loop header
LB: loop body
LE: loop exit
PB: predicated region body
PF: predicated region fallthrough
CT: control target
= control target key end

     0   :  { %10 = vsyncpa [#allocation3], 0  ;;  %s598_s0 = inlined_call_operand.hbm [shape: bf16[8,128], index: 0, kind: input, shape index: {}]   ;;  %s599_s1 = inlined_call_operand.hbm [shape: bf16[128,128], index: 1, kind: input, shape index: {}]   ;;  %s600_s2 = inlined_call_operand.vmem [shape: f32[1,128], index: 2, kind: input, shape index: {}]   ;;  %s601_s3 = inlined_call_operand.hbm [shape: bf16[128,128], index: 3, kind: input, shape index: {}]   ;;  %s602_s4 = inlined_call_operand.vmem [shape: f32[1,128], index: 4, kind: input, shape index: {}]   ;;  %s603_s5 = inlined_call_operand.hbm [shape: f32[8,128], index: 5, kind: output, shape index: {}]  }
   0x1   :  { %11 = vsyncpa [#allocation6], 0 }
   0x2   :  { %12 = vsyncpa [#allocation4], 0  ;;  %s500_s18 = smov [#allocation5]   ;;  %s406_s22 = scalar_lea.hbm %s599_s1, 1024 }
   0x3   :  { %s28_s19 = sshll.u32 %s500_s18, 4  ;;  %p407_p0 = scmp.ne.s32.totalorder %s599_s1, %s406_s22  ;;  %s29_s19 = int_to_ptr.vmem [resolvable:$true] %s28_s19 }
   0x4   :  { %p410_p1 = scmp.lt.u32.totalorder %s406_s22, %s599_s1 }
   0x6   :  { %p412_p2 = pnand %p410_p1, %p407_p0 }
   0x8   :  { %415 = shalt.err (!%p412_p2)
}
   0x9   :  { %s416_s27 = scalar_lea.vmem %s29_s19, 1024  ;;  %p421_p4 = scmp.lt.s32.totalorder %s29_s19, %s29_s19 }
   0xa   :  { %p417_p3 = scmp.ne.s32.totalorder %s29_s19, %s416_s27  ;;  %p422_p5 = scmp.lt.s32.totalorder %s416_s27, %s416_s27 }
   0xc   :  { %p423_p6 = por %p422_p5, %p421_p4 }
   0xe   :  { %p424_p7 = pnand %p423_p6, %p417_p3 }
  0x10   :  { %427 = shalt.err (!%p424_p7)
}
  0x11   :  { %s501_s28 = smov 64   ;;  %s502_s29 = smov 4  }
  0x12   :  { %34 = dma.hbm_to_vmem [thread:$0]  %s599_s1, 1024, %s29_s19, [#allocation6], %s501_s28, %s501_s28, %s502_s29  }
  0x13   :  { %s503_s7 = smov [#allocation2]   ;;  %s504_s9 = smov [#allocation7]  }
  0x14   :  { %s19_s8 = sshll.u32 %s503_s7, 4  ;;  %s42_s10 = sshll.u32 %s504_s9, 4  ;;  %s20_s8 = int_to_ptr.vmem [resolvable:$true] %s19_s8  ;;  %s43_s10 = int_to_ptr.vmem [resolvable:$true] %s42_s10 }
  0x15   :  { %s428_s13 = scalar_lea.hbm %s598_s0, 64 }
  0x16   :  { %p429_p8 = scmp.ne.s32.totalorder %s598_s0, %s428_s13  ;;  %p432_p9 = scmp.lt.u32.totalorder %s428_s13, %s598_s0 }
  0x18   :  { %p434_p10 = pnand %p432_p9, %p429_p8 }
  0x1a   :  { %437 = shalt.err (!%p434_p10)
}
  0x1b   :  { %s438_s1 = scalar_lea.vmem %s20_s8, 64  ;;  %p443_p12 = scmp.lt.s32.totalorder %s20_s8, %s20_s8 }
  0x1c   :  { %p439_p11 = scmp.ne.s32.totalorder %s20_s8, %s438_s1  ;;  %p444_p13 = scmp.lt.s32.totalorder %s438_s1, %s438_s1 }
  0x1e   :  { %p445_p0 = por %p444_p13, %p443_p12 }
  0x20   :  { %p446_p1 = pnand %p445_p0, %p439_p11 }
  0x22   :  { %449 = shalt.err (!%p446_p1)
}
  0x23   :  { %22 = dma.hbm_to_vmem [thread:$0]  %s598_s0, 64, %s20_s8, [#allocation3]  }
  0x24   :  { %s450_s22 = scalar_lea.hbm %s601_s3, 1024 }
  0x25   :  { %p451_p2 = scmp.ne.s32.totalorder %s601_s3, %s450_s22  ;;  %p454_p3 = scmp.lt.u32.totalorder %s450_s22, %s601_s3 }
  0x27   :  { %p456_p4 = pnand %p454_p3, %p451_p2 }
  0x29   :  { %459 = shalt.err (!%p456_p4)
}
  0x2a   :  { %s460_s27 = scalar_lea.vmem %s43_s10, 1024  ;;  %p465_p6 = scmp.lt.s32.totalorder %s43_s10, %s43_s10 }
  0x2b   :  { %p461_p5 = scmp.ne.s32.totalorder %s43_s10, %s460_s27  ;;  %p466_p7 = scmp.lt.s32.totalorder %s460_s27, %s460_s27 }
  0x2d   :  { %p467_p8 = por %p466_p7, %p465_p6 }
  0x2f   :  { %p468_p9 = pnand %p467_p8, %p461_p5 }
  0x31   :  { %471 = shalt.err (!%p468_p9)
}
  0x32   :  { %48 = dma.hbm_to_vmem [thread:$0]  %s601_s3, 1024, %s43_s10, [#allocation6], %s501_s28, %s501_s28, %s502_s29  }
  0x33   :  { %494 = dma.done.wait [#allocation3], 64  }
  0x34   :  { %495 = vsyncadd [#allocation3], 4294967232 }
  0x35   :  { %496 = dma.done.wait [#allocation6], 2048  }
  0x36   :  { %497 = vsyncadd [#allocation6], 4294965248  ;;  %v505_v0 = vmov 0.0   ;;  %vm506_vm0 = vmmov 0   ;;  %v388_v1 = vld [vmem:[#allocation5] sm:$0xff]   ;;  %v389_v2 = vld [vmem:[#allocation5 + $0x8] sm:$0xff]  }
  0x37   :  { %340 = vmatprep.subr.bf16.mxu0 %v505_v0  ;;  %356 = vmatprep.mubr.msk.bf16.mxu0 %vm506_vm0, %v505_v0  ;;  %v390_v3 = vld [vmem:[#allocation5 + $0x10] sm:$0xff]   ;;  %v396_v4 = vld [vmem:[#allocation7] sm:$0xff]   ;;  %v391_v5 = vld [vmem:[#allocation5 + $0x18] sm:$0xff]   ;;  %s507_s7 = smov [#allocation8]  }
  0x38   :  { %360 = vmatprep.subr.bf16.mxu1 %v505_v0  ;;  %376 = vmatprep.mubr.msk.bf16.mxu1 %vm506_vm0, %v505_v0  ;;  %v397_v6 = vld [vmem:[#allocation7 + $0x8] sm:$0xff]   ;;  %v392_v7 = vld [vmem:[#allocation5 + $0x20] sm:$0xff]   ;;  %v398_v8 = vld [vmem:[#allocation7 + $0x10] sm:$0xff]  }
  0x39   :  { %341 = vmatpush3.bf16.msra.mxu0 %v388_v1  ;;  %361 = vmatpush3.bf16.msra.mxu1 %v396_v4  ;;  %v393_v9 = vld [vmem:[#allocation5 + $0x28] sm:$0xff]   ;;  %v399_v10 = vld [vmem:[#allocation7 + $0x18] sm:$0xff]   ;;  %v394_v11 = vld [vmem:[#allocation5 + $0x30] sm:$0xff]  }
  0x3a   :  { %342 = vmatprep.subr.bf16.mxu0 %v505_v0  ;;  %362 = vmatprep.subr.bf16.mxu1 %v505_v0  ;;  %v400_v12 = vld [vmem:[#allocation7 + $0x20] sm:$0xff]   ;;  %v395_v13 = vld [vmem:[#allocation5 + $0x38] sm:$0xff]   ;;  %v401_v14 = vld [vmem:[#allocation7 + $0x28] sm:$0xff]  }
  0x3b   :  { %v61_v15 = vld [vmem:[#allocation2] sm:$0xf]  ;;  %v402_v16 = vld [vmem:[#allocation7 + $0x30] sm:$0xff]  }
  0x3c   :  { %v403_v17 = vld [vmem:[#allocation7 + $0x38] sm:$0xff]  }
  0x3d   :  { %343 = vmatpush3.bf16.msra.mxu0 %v389_v2  ;;  %363 = vmatpush3.bf16.msra.mxu1 %v397_v6  ;;  %v304_v18 = vld [vmem:[%s600_s2] ss:$0 sm:$0xff]  ;;  %s294_s2 = sshll.u32 %s507_s7, 4  ;;  %s295_s2 = int_to_ptr.vmem [resolvable:$true] %s294_s2 }
  0x3e   :  { %344 = vmatprep.subr.bf16.mxu0 %v505_v0  ;;  %364 = vmatprep.subr.bf16.mxu1 %v505_v0  ;;  %v313_v26 = vld [vmem:[%s602_s4] ss:$0 sm:$0xff]  ;;  %s472_s8 = scalar_lea.vmem %s295_s2, 128  ;;  %p477_p11 = scmp.lt.s32.totalorder %s295_s2, %s295_s2 }
  0x3f   :  { %p473_p10 = scmp.ne.s32.totalorder %s295_s2, %s472_s8  ;;  %p478_p12 = scmp.lt.s32.totalorder %s472_s8, %s472_s8 }
  0x41   :  { %345 = vmatpush3.bf16.msra.mxu0 %v390_v3  ;;  %365 = vmatpush3.bf16.msra.mxu1 %v398_v8  ;;  %p479_p13 = por %p478_p12, %p477_p11 }
  0x42   :  { %346 = vmatprep.subr.bf16.mxu0 %v505_v0  ;;  %366 = vmatprep.subr.bf16.mxu1 %v505_v0 }
  0x43   :  { %p480_p0 = pnand %p479_p13, %p473_p10 }
  0x45   :  { %347 = vmatpush3.bf16.msra.mxu0 %v391_v5  ;;  %367 = vmatpush3.bf16.msra.mxu1 %v399_v10 }
  0x46   :  { %348 = vmatprep.subr.bf16.mxu0 %v505_v0  ;;  %368 = vmatprep.subr.bf16.mxu1 %v505_v0 }
  0x49   :  { %349 = vmatpush3.bf16.msra.mxu0 %v392_v7  ;;  %369 = vmatpush3.bf16.msra.mxu1 %v400_v12 }
  0x4a   :  { %350 = vmatprep.subr.bf16.mxu0 %v505_v0  ;;  %370 = vmatprep.subr.bf16.mxu1 %v505_v0 }
  0x4d   :  { %351 = vmatpush3.bf16.msra.mxu0 %v393_v9  ;;  %371 = vmatpush3.bf16.msra.mxu1 %v401_v14 }
  0x4e   :  { %352 = vmatprep.subr.bf16.mxu0 %v505_v0  ;;  %372 = vmatprep.subr.bf16.mxu1 %v505_v0 }
  0x51   :  { %353 = vmatpush3.bf16.msra.mxu0 %v394_v11  ;;  %373 = vmatpush3.bf16.msra.mxu1 %v402_v16 }
  0x52   :  { %354 = vmatprep.subr.bf16.mxu0 %v505_v0  ;;  %374 = vmatprep.subr.bf16.mxu1 %v505_v0 }
  0x55   :  { %355 = vmatpush3.bf16.msra.mxu0 %v395_v13  ;;  %375 = vmatpush3.bf16.msra.mxu1 %v403_v17 }
  0x58   :  { %357 = vmatmul.mubr.bf16.vlgmr.msra.gmra.mrb[0].mxu0 %v61_v15 }
 0x12b   :  { %v167_v19 = vpop.f32.mrb[0].mxu0 }
 0x12c   :  { %v168_v20 = vadd.f32 %v304_v18, %v167_v19  ;;  %v358_v21 = vpop.f32.mrb[1].mxu0 }
 0x12d   :  { %v170_v22 = vpop.f32.mrb[2].mxu0 }
 0x12e   :  { %v173_v23 = vmax.f32 %v168_v20, 0.0  ;;  %v359_v24 = vpop.f32.mrb[3].mxu0 }
 0x130   :  { %v174_v25 = vpack.c.bf16 %v173_v23, %v173_v23 }
 0x132   :  { %377 = vmatmul.mubr.bf16.vlgmr.msra.gmra.mrb[0].mxu1 %v174_v25 }
 0x205   :  { %v280_v27 = vpop.f32.mrb[0].mxu1 }
 0x206   :  { %v281_v28 = vadd.f32 %v313_v26, %v280_v27  ;;  %v378_v29 = vpop.f32.mrb[1].mxu1 }
 0x207   :  { %v283_v30 = vpop.f32.mrb[2].mxu1 }
 0x208   :  { %404 = vtanh.f32 %v281_v28  ;;  %v379_v31 = vpop.f32.mrb[3].mxu1 }
 0x212   :  { %v405_v32 = vpop.eup %404 }
 0x213   :  { %287 = vst [vmem:[#allocation8] sm:$0xff] %v405_v32 }
 0x214   :  { %483 = shalt.err (!%p480_p0)
}
 0x215   :  { %s484_s10 = scalar_lea.hbm %s603_s5, 128 }
 0x216   :  { %p485_p1 = scmp.ne.s32.totalorder %s603_s5, %s484_s10  ;;  %p488_p2 = scmp.lt.u32.totalorder %s484_s10, %s603_s5 }
 0x218   :  { %p490_p3 = pnand %p488_p2, %p485_p1 }
 0x21a   :  { %493 = shalt.err (!%p490_p3)
}
 0x21b   :  { %297 = dma.vmem_to_hbm [thread:$0]  %s295_s2, 128, %s603_s5, [#allocation4]  }
 0x21c   :  { %498 = dma.done.wait [#allocation4], 128  }
 0x21d   :  { %499 = vsyncadd [#allocation4], 4294967168 }
 0x21e   :  { %301 = vsyncpa [#allocation3], 1 }
 0x21f   :  { %302 = vsyncpa [#allocation6], 1 }
 0x220   :  { %303 = vsyncpa [#allocation4], 1 }

</bundles_post_ra>
